<compile_context>
chip_gen: v7x
topology: tpu7x:2x2x1
jax: 0.10.0
libtpu: 0.0.40
codegen_flags: <defaults>
</compile_context>

<pallas_src>
import functools

import jax
import jax.numpy as jnp
from jax import lax
from jax.experimental import pallas as pl
from jax.experimental.pallas import tpu as pltpu

IMAGENET_MEAN = (0.485, 0.456, 0.406)
IMAGENET_STD = (0.229, 0.224, 0.225)
OUT_DIM = 9        # 9-class SIIM-ISIC head
MEL_IDX = 6        # melanoma class index
N_MODELS = 3
FEAT_DIM = 32      # synthetic backbone width (stands in for 2560/2304/2048)
LANE = 128
MAX_TILE_HW = 65536   # spatial (lane) tile upper bound; x tile stays ~2 MiB


def _fused_kernel(x_ref, w_ref, b_ref, wfc_ref, bfc_ref, out_ref, acc_ref,
                  *, chunk, inv_hw, n_pad, feat_dim):
    """One grid step = (batch element b, spatial tile t); all 3 models fused.

    x_ref  : (1, C, tile_hw)               image tile, lane-dense spatial axis
    w_ref  : (N_MODELS*F, C)               stacked 1x1-conv weights (norm folded)
    b_ref  : (N_MODELS*F, 1)               stacked 1x1-conv biases  (norm folded)
    wfc_ref: (N_MODELS, F, OUT_DIM)        classifier (myfc) weights
    bfc_ref: (N_MODELS, 1, OUT_DIM)        classifier biases
    out_ref: (1, 1, 2)                     [1 - p_mel, p_mel] for this image
    acc_ref: (N_MODELS*F, 128) VMEM        lane-dense running sum of max(h, -b)
    """
    t = pl.program_id(1)
    total_f, lane = acc_ref.shape
    tile_hw = x_ref.shape[-1]
    n_chunks = tile_hw // chunk

    @pl.when(t == 0)
    def _():
        acc_ref[...] = jnp.zeros_like(acc_ref)

    w = w_ref[...]                                            # (96, C)
    # relu(h + b) = max(h, -b) + b; broadcast -b once (hoisted out of the loop).
    neg_b = jnp.broadcast_to(-b_ref[...], (total_f, lane))    # (96, 128)

    def body(j, acc):
        start = pl.multiple_of(j * chunk, chunk)
        xc = x_ref[0, :, pl.ds(start, chunk)]                 # (C, chunk)
        h = jnp.dot(w, xc, preferred_element_type=jnp.float32)  # (96, chunk)
        # Lane-block accumulate: 1 max + 1 add per h vreg, no XLU, no reshape.
        for k in range(chunk // lane):
            acc = acc + jnp.maximum(h[:, k * lane:(k + 1) * lane], neg_b)
        return acc

    acc_tile = lax.fori_loop(0, n_chunks, body,
                             jnp.zeros((total_f, lane), jnp.float32))
    acc_ref[...] = acc_ref[...] + acc_tile

    @pl.when(t == pl.num_programs(1) - 1)
    def _():
        # Dropout(0.5) is identity in eval mode.
        b_all = b_ref[...]                                    # (96, 1)
        s = jnp.sum(acc_ref[...], axis=-1, keepdims=True)     # (96, 1)
        if n_pad:
            # Zero-padded spatial lanes each contributed max(0, -b) = relu(-b).
            s = s - n_pad * jnp.maximum(-b_all, 0.0)
        feat = s * inv_hw + b_all                             # GAP features
        mel = jnp.zeros((1, 1), jnp.float32)
        for m in range(N_MODELS):                             # static unroll: 3
            f_m = feat[m * feat_dim:(m + 1) * feat_dim]       # (F, 1)
            logits = (jnp.sum(wfc_ref[m] * f_m, axis=0, keepdims=True)
                      + bfc_ref[m])                           # (1, OUT_DIM)
            mx = jnp.max(logits, axis=-1, keepdims=True)
            e = jnp.exp(logits - mx)
            denom = jnp.sum(e, axis=-1, keepdims=True)
            mel = mel + e[:, MEL_IDX:MEL_IDX + 1] / denom     # exact softmax
        p = mel * (1.0 / N_MODELS)                            # (1, 1)
        out_ref[0, :, 0:1] = 1.0 - p
        out_ref[0, :, 1:2] = p


def _pick_tile_hw(hw_pad, max_tile=MAX_TILE_HW):
    """Largest 128-multiple divisor of hw_pad that is <= max_tile (or full)."""
    if hw_pad <= max_tile:
        return hw_pad
    t = (max_tile // LANE) * LANE
    while t >= LANE:
        if hw_pad % t == 0:
            return t
        t -= LANE
    return hw_pad   # unreachable: hw_pad is a multiple of 128


def _pick_chunk(tile_hw):
    """Inner-loop chunk width (lanes); multiple of 128 dividing tile_hw."""
    for c in (512, 256, 128):
        if tile_hw % c == 0:
            return c
    return LANE


def _fold_and_stack(params):
    """Fold x*0.5+0.5 + ImageNet normalize into the conv; stack the 3 models."""
    mean = jnp.asarray(IMAGENET_MEAN, jnp.float32)
    std = jnp.asarray(IMAGENET_STD, jnp.float32)
    scale = 0.5 / std                # x_norm_c = scale_c * x_c + shift_c
    shift = (0.5 - mean) / std
    w_rows, b_rows, wfc, bfc = [], [], [], []
    for (w1_m, b1_m, wfc_m, bfc_m) in params:
        w_rows.append((w1_m * scale[:, None]).T)                    # (F, C)
        b_rows.append((b1_m.reshape(-1) + shift @ w1_m)[:, None])   # (F, 1)
        wfc.append(wfc_m)                                           # (F, OUT_DIM)
        bfc.append(bfc_m.reshape(1, -1))                            # (1, OUT_DIM)
    w_all = jnp.concatenate(w_rows, axis=0)     # (N_MODELS*F, C)
    b_all = jnp.concatenate(b_rows, axis=0)     # (N_MODELS*F, 1)
    return w_all, b_all, jnp.stack(wfc), jnp.stack(bfc)


def init_params(key):
    """Deterministic synthetic parameters for the 3-model ensemble."""
    params = []
    for i in range(N_MODELS):
        k1, k2, k3, k4, _ = jax.random.split(jax.random.fold_in(key, i), 5)
        w1 = jax.random.normal(k1, (3, FEAT_DIM), jnp.float32) * 0.5
        b1 = jax.random.normal(k2, (1, FEAT_DIM), jnp.float32) * 0.1
        wfc = jax.random.normal(k3, (FEAT_DIM, OUT_DIM), jnp.float32) * 0.2
        bfc = jax.random.normal(k4, (1, OUT_DIM), jnp.float32) * 0.1
        params.append((w1, b1, wfc, bfc))
    return params


def siim_isic_forward(x, params):
    """x: (B, C, H, W) float32 in (-1, 1).  Returns (B, 2) = [1-p_mel, p_mel]."""
    B, C, H, W = x.shape
    hw = H * W
    hw_pad = ((hw + LANE - 1) // LANE) * LANE
    x3 = x.reshape(B, C, hw)       # NCHW -> (B, C, H*W): contiguous view
    if hw_pad != hw:
        x3 = jnp.pad(x3, ((0, 0), (0, 0), (0, hw_pad - hw)))
    tile_hw = _pick_tile_hw(hw_pad)
    chunk = _pick_chunk(tile_hw)
    n_tiles = hw_pad // tile_hw

    w_all, b_all, wfc_all, bfc_all = _fold_and_stack(params)
    total_f = w_all.shape[0]
    feat_dim = total_f // N_MODELS

    kernel = functools.partial(
        _fused_kernel, chunk=chunk, inv_hw=1.0 / hw,
        n_pad=hw_pad - hw, feat_dim=feat_dim)

    out = pl.pallas_call(
        kernel,
        out_shape=jax.ShapeDtypeStruct((B, 1, 2), jnp.float32),
        grid_spec=pltpu.PrefetchScalarGridSpec(
            num_scalar_prefetch=0,
            grid=(B, n_tiles),
            in_specs=[
                pl.BlockSpec((1, C, tile_hw), lambda b, t: (b, 0, t)),
                pl.BlockSpec((total_f, C), lambda b, t: (0, 0)),
                pl.BlockSpec((total_f, 1), lambda b, t: (0, 0)),
                pl.BlockSpec((N_MODELS, feat_dim, OUT_DIM),
                             lambda b, t: (0, 0, 0)),
                pl.BlockSpec((N_MODELS, 1, OUT_DIM), lambda b, t: (0, 0, 0)),
            ],
            out_specs=pl.BlockSpec((1, 1, 2), lambda b, t: (b, 0, 0)),
            scratch_shapes=[pltpu.VMEM((total_f, LANE), jnp.float32)],
        ),
        compiler_params=pltpu.CompilerParams(
            dimension_semantics=("parallel", "arbitrary"),
            vmem_limit_bytes=32 * 1024 * 1024,
        ),
    )(x3, w_all, b_all, wfc_all, bfc_all)
    return out.reshape(B, 2)


if __name__ == "__main__":
    key = jax.random.PRNGKey(0)
    kx, kp = jax.random.split(key)
    x = jax.random.uniform(kx, (2, 3, 16, 16), jnp.float32,
                           minval=-1.0, maxval=1.0)
    params = init_params(kp)
    out = siim_isic_forward(x, params)
    out = jax.block_until_ready(out)
    assert out.shape == (2, 2) and out.dtype == jnp.float32
    assert bool(jnp.all(jnp.isfinite(out)))
    assert bool(jnp.allclose(out.sum(axis=1), 1.0, atol=1e-5))
    assert bool(jnp.all(out >= 0.0)) and bool(jnp.all(out <= 1.0))
    print("KERNEL_OK")
</pallas_src>

<mosaic_0001>
module attributes {stable_mosaic.version = 11 : i64} {
  func.func @_fused_kernel(%arg0: i32, %arg1: i32, %arg2: memref<1x3x256xf32, #tpu.memory_space<vmem>>, %arg3: memref<96x3xf32, #tpu.memory_space<vmem>>, %arg4: memref<96x1xf32, #tpu.memory_space<vmem>>, %arg5: memref<3x32x9xf32, #tpu.memory_space<vmem>>, %arg6: memref<3x1x9xf32, #tpu.memory_space<vmem>>, %arg7: memref<1x1x2xf32, #tpu.memory_space<vmem>>, %arg8: memref<96x128xf32, #tpu.memory_space<vmem>>) attributes {dimension_semantics = [#tpu.dimension_semantics<parallel>, #tpu.dimension_semantics<arbitrary>], iteration_bounds = array<i64: 2, 1>, scalar_prefetch = 0 : i64, scratch_operands = 1 : i64, tpu.core_type = #tpu.core_type<tc>, window_params = [{transform_indices = @transform_0, window_bounds = array<i64: 1, 3, 256>}, {pipeline_mode = #tpu.pipeline_mode<synchronous>, transform_indices = @transform_1, window_bounds = array<i64: 96, 3>}, {pipeline_mode = #tpu.pipeline_mode<synchronous>, transform_indices = @transform_2, window_bounds = array<i64: 96, 1>}, {pipeline_mode = #tpu.pipeline_mode<synchronous>, transform_indices = @transform_3, window_bounds = array<i64: 3, 32, 9>}, {pipeline_mode = #tpu.pipeline_mode<synchronous>, transform_indices = @transform_4, window_bounds = array<i64: 3, 1, 9>}, {transform_indices = @transform_5, window_bounds = array<i64: 1, 1, 2>}]} {
    %c0_i32 = arith.constant 0 : i32
    %0 = arith.cmpi eq, %arg1, %c0_i32 : i32
    %1 = arith.extui %0 : i1 to i32
    %c0_i32_0 = arith.constant 0 : i32
    %2 = arith.cmpi ne, %1, %c0_i32_0 : i32
    scf.if %2 {
      %cst_15 = arith.constant 0.000000e+00 : f32
      %28 = vector.broadcast %cst_15 : f32 to vector<96x128xf32>
      %c0_16 = arith.constant 0 : index
      %c0_17 = arith.constant 0 : index
      %29 = vector.load %arg8[%c0_16, %c0_17] : memref<96x128xf32, #tpu.memory_space<vmem>>, vector<96x128xf32>
      tpu.vector_store %arg8[%c0_16, %c0_17], %28 {strides = array<i32>} : memref<96x128xf32, #tpu.memory_space<vmem>>, vector<96x128xf32>,
    } else {
    }
    %c0 = arith.constant 0 : index
    %c0_1 = arith.constant 0 : index
    %3 = vector.load %arg3[%c0, %c0_1] : memref<96x3xf32, #tpu.memory_space<vmem>>, vector<96x3xf32>
    %c0_2 = arith.constant 0 : index
    %c0_3 = arith.constant 0 : index
    %4 = vector.load %arg4[%c0_2, %c0_3] : memref<96x1xf32, #tpu.memory_space<vmem>>, vector<96x1xf32>
    %cst = arith.constant 0.000000e+00 : f32
    %5 = vector.broadcast %cst : f32 to vector<96x1xf32>
    %6 = arith.subf %5, %4 : vector<96x1xf32>
    %7 = vector.shape_cast %6 : vector<96x1xf32> to vector<96x1xf32>
    %8 = vector.broadcast %7 : vector<96x1xf32> to vector<96x128xf32>
    %cst_4 = arith.constant 0.000000e+00 : f32
    %9 = vector.broadcast %cst_4 : f32 to vector<96x128xf32>
    %c0_i32_5 = arith.constant 0 : i32
    %c256_i32 = arith.constant 256 : i32
    %10 = arith.muli %c0_i32_5, %c256_i32 : i32
    %11 = tpu.assume_multiple %10, 256 : i32
    %c0_6 = arith.constant 0 : index
    %c0_7 = arith.constant 0 : index
    %12 = arith.index_cast %11 : i32 to index
    %13 = vector.load %arg2[%c0_6, %c0_7, %12] : memref<1x3x256xf32, #tpu.memory_space<vmem>>, vector<1x3x256xf32>
    %14 = vector.shape_cast %13 : vector<1x3x256xf32> to vector<3x256xf32>
    %cst_8 = arith.constant dense<0.000000e+00> : vector<96x256xf32>
    %15 = tpu.matmul %3, %14, %cst_8 {dimension_numbers = #tpu.dot_dimension_numbers<[1], [0], [0], [1], [0, 0, 1, 1], [], []>} : vector<96x3xf32>, vector<3x256xf32>, vector<96x256xf32> -> vector<96x256xf32>
    %16 = vector.extract_strided_slice %15 {offsets = [0, 0], sizes = [96, 128], strides = [1, 1]} : vector<96x256xf32> to vector<96x128xf32>
    %17 = arith.maximumf %16, %8 : vector<96x128xf32>
    %18 = arith.addf %9, %17 : vector<96x128xf32>
    %19 = vector.extract_strided_slice %15 {offsets = [0, 128], sizes = [96, 128], strides = [1, 1]} : vector<96x256xf32> to vector<96x128xf32>
    %20 = arith.maximumf %19, %8 : vector<96x128xf32>
    %21 = arith.addf %18, %20 : vector<96x128xf32>
    %c1_i32 = arith.constant 1 : i32
    %c0_9 = arith.constant 0 : index
    %c0_10 = arith.constant 0 : index
    %22 = vector.load %arg8[%c0_9, %c0_10] : memref<96x128xf32, #tpu.memory_space<vmem>>, vector<96x128xf32>
    %23 = arith.addf %22, %21 : vector<96x128xf32>
    %c0_11 = arith.constant 0 : index
    %c0_12 = arith.constant 0 : index
    %24 = vector.load %arg8[%c0_11, %c0_12] : memref<96x128xf32, #tpu.memory_space<vmem>>, vector<96x128xf32>
    tpu.vector_store %arg8[%c0_11, %c0_12], %23 {strides = array<i32>} : memref<96x128xf32, #tpu.memory_space<vmem>>, vector<96x128xf32>,
    %c0_i32_13 = arith.constant 0 : i32
    %25 = arith.cmpi eq, %arg1, %c0_i32_13 : i32
    %26 = arith.extui %25 : i1 to i32
    %c0_i32_14 = arith.constant 0 : i32
    %27 = arith.cmpi ne, %26, %c0_i32_14 : i32
    scf.if %27 {
      %c0_15 = arith.constant 0 : index
      %c0_16 = arith.constant 0 : index
      %28 = vector.load %arg4[%c0_15, %c0_16] : memref<96x1xf32, #tpu.memory_space<vmem>>, vector<96x1xf32>
      %c0_17 = arith.constant 0 : index
      %c0_18 = arith.constant 0 : index
      %29 = vector.load %arg8[%c0_17, %c0_18] : memref<96x128xf32, #tpu.memory_space<vmem>>, vector<96x128xf32>
      %cst_19 = arith.constant dense<0.000000e+00> : vector<96xf32>
      %30 = vector.multi_reduction <add>, %29, %cst_19 [1] : vector<96x128xf32> to vector<96xf32>
      %31 = vector.shape_cast %30 : vector<96xf32> to vector<96x1xf32>
      %cst_20 = arith.constant 3.906250e-03 : f32
      %32 = vector.broadcast %cst_20 : f32 to vector<96x1xf32>
      %33 = arith.mulf %31, %32 : vector<96x1xf32>
      %34 = arith.addf %33, %28 : vector<96x1xf32>
      %cst_21 = arith.constant 0.000000e+00 : f32
      %35 = vector.broadcast %cst_21 : f32 to vector<1x1xf32>
      %36 = vector.extract_strided_slice %34 {offsets = [0, 0], sizes = [32, 1], strides = [1, 1]} : vector<96x1xf32> to vector<32x1xf32>
      %c0_22 = arith.constant 0 : index
      %c0_23 = arith.constant 0 : index
      %c0_24 = arith.constant 0 : index
      %37 = vector.load %arg5[%c0_22, %c0_23, %c0_24] : memref<3x32x9xf32, #tpu.memory_space<vmem>>, vector<1x32x9xf32>
      %38 = vector.shape_cast %37 : vector<1x32x9xf32> to vector<32x9xf32>
      %39 = vector.broadcast %36 : vector<32x1xf32> to vector<32x9xf32>
      %40 = arith.mulf %38, %39 : vector<32x9xf32>
      %cst_25 = arith.constant dense<0.000000e+00> : vector<9xf32>
      %41 = vector.multi_reduction <add>, %40, %cst_25 [0] : vector<32x9xf32> to vector<9xf32>
      %42 = vector.shape_cast %41 : vector<9xf32> to vector<1x9xf32>
      %c0_26 = arith.constant 0 : index
      %c0_27 = arith.constant 0 : index
      %c0_28 = arith.constant 0 : index
      %43 = vector.load %arg6[%c0_26, %c0_27, %c0_28] : memref<3x1x9xf32, #tpu.memory_space<vmem>>, vector<1x1x9xf32>
      %44 = vector.shape_cast %43 : vector<1x1x9xf32> to vector<1x9xf32>
      %45 = arith.addf %42, %44 : vector<1x9xf32>
      %cst_29 = arith.constant dense<0xFF800000> : vector<1xf32>
      %46 = vector.multi_reduction <maximumf>, %45, %cst_29 [1] : vector<1x9xf32> to vector<1xf32>
      %47 = vector.shape_cast %46 : vector<1xf32> to vector<1x1xf32>
      %48 = vector.broadcast %47 : vector<1x1xf32> to vector<1x9xf32>
      %49 = arith.subf %45, %48 : vector<1x9xf32>
      %50 = math.exp %49 : vector<1x9xf32>
      %cst_30 = arith.constant dense<0.000000e+00> : vector<1xf32>
      %51 = vector.multi_reduction <add>, %50, %cst_30 [1] : vector<1x9xf32> to vector<1xf32>
      %52 = vector.shape_cast %51 : vector<1xf32> to vector<1x1xf32>
      %53 = vector.extract_strided_slice %50 {offsets = [0, 6], sizes = [1, 1], strides = [1, 1]} : vector<1x9xf32> to vector<1x1xf32>
      %54 = arith.divf %53, %52 : vector<1x1xf32>
      %55 = arith.addf %35, %54 : vector<1x1xf32>
      %56 = vector.extract_strided_slice %34 {offsets = [32, 0], sizes = [32, 1], strides = [1, 1]} : vector<96x1xf32> to vector<32x1xf32>
      %c1 = arith.constant 1 : index
      %c0_31 = arith.constant 0 : index
      %c0_32 = arith.constant 0 : index
      %57 = vector.load %arg5[%c1, %c0_31, %c0_32] : memref<3x32x9xf32, #tpu.memory_space<vmem>>, vector<1x32x9xf32>
      %58 = vector.shape_cast %57 : vector<1x32x9xf32> to vector<32x9xf32>
      %59 = vector.broadcast %56 : vector<32x1xf32> to vector<32x9xf32>
      %60 = arith.mulf %58, %59 : vector<32x9xf32>
      %cst_33 = arith.constant dense<0.000000e+00> : vector<9xf32>
      %61 = vector.multi_reduction <add>, %60, %cst_33 [0] : vector<32x9xf32> to vector<9xf32>
      %62 = vector.shape_cast %61 : vector<9xf32> to vector<1x9xf32>
      %c1_34 = arith.constant 1 : index
      %c0_35 = arith.constant 0 : index
      %c0_36 = arith.constant 0 : index
      %63 = vector.load %arg6[%c1_34, %c0_35, %c0_36] : memref<3x1x9xf32, #tpu.memory_space<vmem>>, vector<1x1x9xf32>
      %64 = vector.shape_cast %63 : vector<1x1x9xf32> to vector<1x9xf32>
      %65 = arith.addf %62, %64 : vector<1x9xf32>
      %cst_37 = arith.constant dense<0xFF800000> : vector<1xf32>
      %66 = vector.multi_reduction <maximumf>, %65, %cst_37 [1] : vector<1x9xf32> to vector<1xf32>
      %67 = vector.shape_cast %66 : vector<1xf32> to vector<1x1xf32>
      %68 = vector.broadcast %67 : vector<1x1xf32> to vector<1x9xf32>
      %69 = arith.subf %65, %68 : vector<1x9xf32>
      %70 = math.exp %69 : vector<1x9xf32>
      %cst_38 = arith.constant dense<0.000000e+00> : vector<1xf32>
      %71 = vector.multi_reduction <add>, %70, %cst_38 [1] : vector<1x9xf32> to vector<1xf32>
      %72 = vector.shape_cast %71 : vector<1xf32> to vector<1x1xf32>
      %73 = vector.extract_strided_slice %70 {offsets = [0, 6], sizes = [1, 1], strides = [1, 1]} : vector<1x9xf32> to vector<1x1xf32>
      %74 = arith.divf %73, %72 : vector<1x1xf32>
      %75 = arith.addf %55, %74 : vector<1x1xf32>
      %76 = vector.extract_strided_slice %34 {offsets = [64, 0], sizes = [32, 1], strides = [1, 1]} : vector<96x1xf32> to vector<32x1xf32>
      %c2 = arith.constant 2 : index
      %c0_39 = arith.constant 0 : index
      %c0_40 = arith.constant 0 : index
      %77 = vector.load %arg5[%c2, %c0_39, %c0_40] : memref<3x32x9xf32, #tpu.memory_space<vmem>>, vector<1x32x9xf32>
      %78 = vector.shape_cast %77 : vector<1x32x9xf32> to vector<32x9xf32>
      %79 = vector.broadcast %76 : vector<32x1xf32> to vector<32x9xf32>
      %80 = arith.mulf %78, %79 : vector<32x9xf32>
      %cst_41 = arith.constant dense<0.000000e+00> : vector<9xf32>
      %81 = vector.multi_reduction <add>, %80, %cst_41 [0] : vector<32x9xf32> to vector<9xf32>
      %82 = vector.shape_cast %81 : vector<9xf32> to vector<1x9xf32>
      %c2_42 = arith.constant 2 : index
      %c0_43 = arith.constant 0 : index
      %c0_44 = arith.constant 0 : index
      %83 = vector.load %arg6[%c2_42, %c0_43, %c0_44] : memref<3x1x9xf32, #tpu.memory_space<vmem>>, vector<1x1x9xf32>
      %84 = vector.shape_cast %83 : vector<1x1x9xf32> to vector<1x9xf32>
      %85 = arith.addf %82, %84 : vector<1x9xf32>
      %cst_45 = arith.constant dense<0xFF800000> : vector<1xf32>
      %86 = vector.multi_reduction <maximumf>, %85, %cst_45 [1] : vector<1x9xf32> to vector<1xf32>
      %87 = vector.shape_cast %86 : vector<1xf32> to vector<1x1xf32>
      %88 = vector.broadcast %87 : vector<1x1xf32> to vector<1x9xf32>
      %89 = arith.subf %85, %88 : vector<1x9xf32>
      %90 = math.exp %89 : vector<1x9xf32>
      %cst_46 = arith.constant dense<0.000000e+00> : vector<1xf32>
      %91 = vector.multi_reduction <add>, %90, %cst_46 [1] : vector<1x9xf32> to vector<1xf32>
      %92 = vector.shape_cast %91 : vector<1xf32> to vector<1x1xf32>
      %93 = vector.extract_strided_slice %90 {offsets = [0, 6], sizes = [1, 1], strides = [1, 1]} : vector<1x9xf32> to vector<1x1xf32>
      %94 = arith.divf %93, %92 : vector<1x1xf32>
      %95 = arith.addf %75, %94 : vector<1x1xf32>
      %cst_47 = arith.constant 0.333333343 : f32
      %96 = vector.broadcast %cst_47 : f32 to vector<1x1xf32>
      %97 = arith.mulf %95, %96 : vector<1x1xf32>
      %cst_48 = arith.constant 1.000000e+00 : f32
      %98 = vector.broadcast %cst_48 : f32 to vector<1x1xf32>
      %99 = arith.subf %98, %97 : vector<1x1xf32>
      %c0_49 = arith.constant 0 : index
      %c0_50 = arith.constant 0 : index
      %c0_51 = arith.constant 0 : index
      %100 = vector.load %arg7[%c0_49, %c0_50, %c0_51] : memref<1x1x2xf32, #tpu.memory_space<vmem>>, vector<1x1x1xf32>
      %101 = vector.shape_cast %100 : vector<1x1x1xf32> to vector<1x1xf32>
      %102 = vector.shape_cast %99 : vector<1x1xf32> to vector<1x1x1xf32>
      tpu.vector_store %arg7[%c0_49, %c0_50, %c0_51], %102 {strides = array<i32>} : memref<1x1x2xf32, #tpu.memory_space<vmem>>, vector<1x1x1xf32>,
      %c0_52 = arith.constant 0 : index
      %c0_53 = arith.constant 0 : index
      %c1_54 = arith.constant 1 : index
      %103 = vector.load %arg7[%c0_52, %c0_53, %c1_54] : memref<1x1x2xf32, #tpu.memory_space<vmem>>, vector<1x1x1xf32>
      %104 = vector.shape_cast %103 : vector<1x1x1xf32> to vector<1x1xf32>
      %105 = vector.shape_cast %97 : vector<1x1xf32> to vector<1x1x1xf32>
      tpu.vector_store %arg7[%c0_52, %c0_53, %c1_54], %105 {strides = array<i32>} : memref<1x1x2xf32, #tpu.memory_space<vmem>>, vector<1x1x1xf32>,
    } else {
    }
    return
  }
  func.func @transform_0(%arg0: i32, %arg1: i32) -> (i32, i32, i32) {
    %c0_i32 = arith.constant 0 : i32
    %c0_i32_0 = arith.constant 0 : i32
    return %arg0, %c0_i32, %arg1 : i32, i32, i32
  }
  func.func @transform_1(%arg0: i32, %arg1: i32) -> (i32, i32) {
    %c0_i32 = arith.constant 0 : i32
    %c0_i32_0 = arith.constant 0 : i32
    %c0_i32_1 = arith.constant 0 : i32
    return %c0_i32, %c0_i32_0 : i32, i32
  }
  func.func @transform_2(%arg0: i32, %arg1: i32) -> (i32, i32) {
    %c0_i32 = arith.constant 0 : i32
    %c0_i32_0 = arith.constant 0 : i32
    %c0_i32_1 = arith.constant 0 : i32
    return %c0_i32, %c0_i32_0 : i32, i32
  }
  func.func @transform_3(%arg0: i32, %arg1: i32) -> (i32, i32, i32) {
    %c0_i32 = arith.constant 0 : i32
    %c0_i32_0 = arith.constant 0 : i32
    %c0_i32_1 = arith.constant 0 : i32
    %c0_i32_2 = arith.constant 0 : i32
    return %c0_i32, %c0_i32_0, %c0_i32_1 : i32, i32, i32
  }
  func.func @transform_4(%arg0: i32, %arg1: i32) -> (i32, i32, i32) {
    %c0_i32 = arith.constant 0 : i32
    %c0_i32_0 = arith.constant 0 : i32
    %c0_i32_1 = arith.constant 0 : i32
    %c0_i32_2 = arith.constant 0 : i32
    return %c0_i32, %c0_i32_0, %c0_i32_1 : i32, i32, i32
  }
  func.func @transform_5(%arg0: i32, %arg1: i32) -> (i32, i32, i32) {
    %c0_i32 = arith.constant 0 : i32
    %c0_i32_0 = arith.constant 0 : i32
    %c0_i32_1 = arith.constant 0 : i32
    return %arg0, %c0_i32, %c0_i32_0 : i32, i32, i32
  }
}

</mosaic_0001>

<bundles_post_ra>
// kernel: tpu_custom_call.1
= control target key start
LH: loop header
LB: loop body
LE: loop exit
PB: predicated region body
PF: predicated region fallthrough
CT: control target
= control target key end

     0   :  { %10 = vsyncpa [#allocation4], 0  ;;  %s1523_s0 = inlined_call_operand.vmem [shape: f32[2,3,256], index: 0, kind: input, shape index: {}]   ;;  %s1524_s1 = inlined_call_operand.vmem [shape: f32[96,3], index: 1, kind: input, shape index: {}]   ;;  %s1525_s2 = inlined_call_operand.vmem [shape: f32[96,1], index: 2, kind: input, shape index: {}]   ;;  %s1526_s3 = inlined_call_operand.vmem [shape: f32[3,32,9], index: 3, kind: input, shape index: {}]   ;;  %s1527_s4 = inlined_call_operand.vmem [shape: f32[3,1,9], index: 4, kind: input, shape index: {}]   ;;  %s1528_s5 = inlined_call_operand.hbm [shape: f32[2,1,2], index: 5, kind: output, shape index: {}]  }
   0x1   :  { %12 = vsyncpa [#allocation4 + $0x1], 0  ;;  %s1196_s18 = smov 0   ;;  %s1198_s19 = smov 0  }
   0x2   :  { %s1200_s20 = smov 0   ;;  %s1202_s21 = smov 0  }
   0x3   :  { %s1204_s22 = smov 0   ;;  %s1206_s23 = smov 0  }
   0x4 LB: > { %s970_s24 = sadd.s32 4294967295, %s1159_s23   ;;  %s971_s25 = sadd.s32 4294967294, %s1159_s23   ;;  %s1159_s23 = sphi %s1206_s23, %s18_s23   ;;  %s1155_s22 = sphi %s1204_s22, %s1535_s22   ;;  %s1151_s21 = sphi %s1202_s21, %s1534_s21   ;;  %s1147_s20 = sphi %s1200_s20, %s1533_s20   ;;  %s1143_s19 = sphi %s1198_s19, %s1532_s19   ;;  %s1139_s18 = sphi %s1196_s18, %s1531_s18  }
   0x5   : > { %s30_s26 = sadd.s32 1, %s1155_s22  ;;  %s149_s27 = sadd.s32 1, %s1147_s20 }
   0x6   : > { %p32_p0 = scmp.ge.s32.totalorder %s30_s26, 2  ;;  %p159_p1 = scmp.ne.s32.totalorder %s1147_s20, %s1143_s19 }
   0x7   : > { %p160_p2 = scmp.eq.s32.totalorder %s970_s24, 1  ;;  %p165_p3 = scmp.ne.s32.totalorder %s1143_s19, %s1139_s18 }
   0x8   : > { %s1537_s26 = smov (%p32_p0, %s30_s26), 0  ;;  %p166_p5 = scmp.eq.s32.totalorder %s971_s25, 1 }
   0x9   : > { %p1236_p4 = por %p160_p2, %p159_p1  ;;  %s146_s29 = ssub.s32 %s1155_s22, %s1537_s26 }
   0xa   : > { %p974_p6 = scmp.ge.s32.totalorder %s1159_s23, 1  ;;  %p147_p7 = scmp.eq.s32.totalorder %s146_s29, 0 }
   0xb   : > { %p1243_p8 = por %p166_p5, %p165_p3  ;;  %p209_p9 = scmp.lt.s32.totalorder %s1159_s23, 3 }
   0xc   : > { %s1249_s6 = scalar_select %p147_p7, %s1147_s20, %s149_s27  }
   0xd   : > { %p210_p10 = pnand %p974_p6, %p209_p9 }
   0xe   : > { %p241_p11 = scmp.lt.s32.totalorder (!%p210_p10), %s1151_s21, 1  ;;  %v1161_v0 = vmov (!%p210_p10), 0.0   ;;  %v1162_v1 = vmov (!%p210_p10), 0   ;;  %v1258_v2 = vld [vmem:[%s1525_s2 + $0x20] sm:$0xff] (!%p210_p10)  ;;  %vm402_vm0 = vcmask (!%p210_p10), 1042432   ;;  %v1272_v6 = vld [vmem:[%s1525_s2 + $0x28] sm:$0xff] (!%p210_p10) }
   0xf   : > { %213 = sbr.rel (%p210_p10) target bundleno = 1019 (0x3fb), region = 40  ;;  %471 = vmatprep.mubr.f32.mxu0 (!%p210_p10), %v1161_v0  ;;  %507 = vmatprep.mubr.f32.mxu1 (!%p210_p10), %v1161_v0  ;;  %v294_v3 = vsub.f32 (!%p210_p10), 0.0, %v1258_v2  ;;  %v1267_v4 = vld [vmem:[%s1525_s2] sm:$0xff] (!%p210_p10)  ;;  %v1278_v8 = vld [vmem:[%s1525_s2 + $0x8] sm:$0xff] (!%p210_p10)  ;;  %vm365_vm1 = vcmask (!%p210_p10), 23552   ;;  %v272_v11 = vld [vmem:[%s1524_s1 + $0x30] sm:$0xff] (!%p210_p10) }
  0x10   : > { %1067 = vset.pattern.permute.xlu1 (!%p210_p10), %v1162_v1  ;;  %1066 = vset.pattern.permute.xlu0 (!%p210_p10), %v1162_v1  ;;  %v290_v7 = vsub.f32 (!%p210_p10), 0.0, %v1267_v4  ;;  %v266_v10 = vld [vmem:[%s1524_s1] sm:$0xff] (!%p210_p10)  ;;  %v295_v12 = vsub.f32 (!%p210_p10), 0.0, %v1272_v6  ;;  %v291_v13 = vsub.f32 (!%p210_p10), 0.0, %v1278_v8  ;;  %v1291_v14 = vld [vmem:[%s1525_s2 + $0x30] sm:$0xff] (!%p210_p10)  ;;  %v267_v16 = vld [vmem:[%s1524_s1 + $0x8] sm:$0xff] (!%p210_p10) }
  0x11   : > { %324 = vperm.xlu1 (!%p210_p10), %1067, %v294_v3   ;;  %v1296_v15 = vld [vmem:[%s1525_s2 + $0x10] sm:$0xff] (!%p210_p10)  ;;  %v273_v17 = vld [vmem:[%s1524_s1 + $0x38] sm:$0xff] (!%p210_p10)  ;;  %v296_v18 = vsub.f32 (!%p210_p10), 0.0, %v1291_v14  ;;  %v1313_v20 = vld [vmem:[%s1525_s2 + $0x48] sm:$0xff] (!%p210_p10)  ;;  %vm731_vm2 = vcmask (!%p210_p10), 72704   ;;  %vm747_vm3 = vcmask (!%p210_p10), 65536  }
  0x12   : > { %304 = vperm.xlu0 (!%p210_p10), %1066, %v290_v7   ;;  %v292_v19 = vsub.f32 (!%p210_p10), 0.0, %v1296_v15  ;;  %v1318_v21 = vld [vmem:[%s1525_s2 + $0x40] sm:$0xff] (!%p210_p10)  ;;  %v268_v22 = vld [vmem:[%s1524_s1 + $0x10] sm:$0xff] (!%p210_p10)  ;;  %v299_v24 = vsub.f32 (!%p210_p10), 0.0, %v1313_v20  ;;  %v1335_v26 = vld [vmem:[%s1525_s2 + $0x38] sm:$0xff] (!%p210_p10)  ;;  %s1163_s15 = smov (!%p210_p10), 123  }
  0x13   : > { %v274_v23 = vld [vmem:[%s1524_s1 + $0x40] sm:$0xff] (!%p210_p10)  ;;  %v298_v25 = vsub.f32 (!%p210_p10), 0.0, %v1318_v21  ;;  %v1340_v27 = vld [vmem:[%s1525_s2 + $0x18] sm:$0xff] (!%p210_p10)  ;;  %v275_v29 = vld [vmem:[%s1524_s1 + $0x48] sm:$0xff] (!%p210_p10)  ;;  %v297_v30 = vsub.f32 (!%p210_p10), 0.0, %v1335_v26  ;;  %s1164_s16 = smov (!%p210_p10), 122  }
  0x14   : > { %v269_v28 = vld [vmem:[%s1524_s1 + $0x18] sm:$0xff] (!%p210_p10)  ;;  %v293_v31 = vsub.f32 (!%p210_p10), 0.0, %v1340_v27  ;;  %v1362_v33 = vld [vmem:[%s1525_s2 + $0x50] sm:$0xff] (!%p210_p10)  ;;  %v270_v34 = vld [vmem:[%s1524_s1 + $0x20] sm:$0xff] (!%p210_p10)  ;;  %s238_s17 = sand.u32 (!%p210_p10), 1, %s1143_s19   ;;  %s1001_s24 = sshll.u32 (!%p210_p10), %s1151_s21, 4 }
  0x15   : > { %329 = vperm.xlu1 (!%p210_p10), %1067, %v295_v12   ;;  %v1357_v32 = vld [vmem:[%s1525_s2 + $0x58] sm:$0xff] (!%p210_p10)  ;;  %v276_v35 = vld [vmem:[%s1524_s1 + $0x50] sm:$0xff] (!%p210_p10)  ;;  %v300_v37 = vsub.f32 (!%p210_p10), 0.0, %v1362_v33  ;;  %v271_v38 = vld [vmem:[%s1524_s1 + $0x28] sm:$0xff] (!%p210_p10)  ;;  %s239_s25 = scalar_lea.vmem (!%p210_p10), [#allocation3], %s238_s17  ;;  %vm880_vm4 = vcmask (!%p210_p10), 0  }
  0x16   : > { %s242_s7 = scalar_select %p241_p11, %s1151_s21, 1  ;;  %309 = vperm.xlu0 %1066, %v291_v13   ;;  %v301_v36 = vsub.f32 0.0, %v1357_v32  ;;  %v277_v39 = vld [vmem:[%s1524_s1 + $0x58] sm:$0xff]  ;;  %vm886_vm5 = vcmask 8200  }
  0x17   : > { %s901_s27 = sshll.u32 %s239_s25, 4  ;;  %s889_s9 = scalar_lea.sflag [#allocation4], %s238_s17  ;;  %s1478_s27 = int_to_ptr.vmem [resolvable:$true] %s901_s27 }
  0x18   : > { %s1004_s8 = sshll.u32 %s242_s7, 3  ;;  %s1081_s21 = scalar_lea.vmem %s1478_s27, 16 }
  0x19   : > { %s248_s13 = scalar_lea.vmem %s1523_s0, %s1004_s8  ;;  %334 = vperm.xlu1 %1067, %v296_v18   ;;  %s1476_s8 = scalar_lea.hbm %s1528_s5, %s1001_s24 }
  0x1a   : > { %v362_v5 = vld [vmem:[%s248_s13] sm:$0x77]  ;;  %314 = vperm.xlu0 %1066, %v292_v19   ;;  %p1082_p12 = scmp.ne.s32.totalorder %s1478_s27, %s1081_s21  ;;  %s1165_s10 = smov [#allocation3]  }
  0x1b   : > { %v364_v9 = vcombine.high %v362_v5, %v362_v5  ;;  %s1085_s11 = sshll.u32 %s1165_s10, 4  ;;  %s1086_s11 = int_to_ptr.vmem [resolvable:$false] %s1085_s11 }
  0x1c   : > { %p1083_p13 = pnand %p1082_p12, %p1236_p4  ;;  %s1087_s12 = scalar_lea.vmem %s1086_s11, 32 }
  0x1d   : > { %977 = vmatprep.subr.msk.mxu0 %vm402_vm0, %v364_v9  ;;  %1005 = vmatprep.subr.msk.mxu1 %vm402_vm0, %v364_v9  ;;  %p1088_p1 = scmp.lt.s32.totalorder %s1478_s27, %s1086_s11  ;;  %p1089_p2 = scmp.lt.s32.totalorder %s1087_s12, %s1081_s21 }
  0x1e   : > { %978 = vmatpush1.msk.msra.mxu0 %vm402_vm0, %v362_v5  ;;  %1006 = vmatpush1.msk.msra.mxu1 %vm402_vm0, %v362_v5  ;;  %p1084_p0 = pneg %p1083_p13 }
  0x1f   : > { %979 = vmatmul.mubr.msk.f32.vlgmr.msra.gmra.mrb[0].mxu0 %vm365_vm1, %v266_v10  ;;  %985 = vmatmul.mubr.msk.f32.vlgmr.msra.gmra.mrb[0].mxu1 %vm365_vm1, %v272_v11  ;;  %p1090_p3 = por %p1089_p2, %p1088_p1 }
  0x20   : > { %477 = vmatprep.mubr.f32.mxu0 %v1161_v0  ;;  %513 = vmatprep.mubr.f32.mxu1 %v1161_v0 }
  0x21   : > { %349 = vperm.xlu1 %1067, %v299_v24   ;;  %344 = vperm.xlu0 %1066, %v298_v25   ;;  %p1091_p5 = pnand %p1090_p3, %p1084_p0 }
  0x23   : > { %980 = vmatmul.mubr.msk.f32.gmra.mrb[2].mxu0 %vm365_vm1, %v267_v16  ;;  %986 = vmatmul.mubr.msk.f32.gmra.mrb[2].mxu1 %vm365_vm1, %v273_v17 }
  0x24   : > { %483 = vmatprep.mubr.f32.mxu0 %v1161_v0  ;;  %519 = vmatprep.mubr.f32.mxu1 %v1161_v0 }
  0x25   : > { %339 = vperm.xlu1 %1067, %v297_v30   ;;  %319 = vperm.xlu0 %1066, %v293_v31  }
  0x27   : > { %981 = vmatmul.mubr.msk.f32.gmra.mrb[4].mxu0 %vm365_vm1, %v268_v22  ;;  %987 = vmatmul.mubr.msk.f32.gmra.mrb[4].mxu1 %vm365_vm1, %v274_v23 }
  0x28   : > { %489 = vmatprep.mubr.f32.mxu0 %v1161_v0  ;;  %525 = vmatprep.mubr.f32.mxu1 %v1161_v0 }
  0x29   : > { %359 = vperm.xlu1 %1067, %v301_v36   ;;  %354 = vperm.xlu0 %1066, %v300_v37  }
  0x2b   : > { %982 = vmatmul.mubr.msk.f32.gmra.mrb[6].mxu0 %vm365_vm1, %v269_v28  ;;  %988 = vmatmul.mubr.msk.f32.gmra.mrb[6].mxu1 %vm365_vm1, %v275_v29 }
  0x2c   : > { %495 = vmatprep.mubr.f32.mxu0 %v1161_v0  ;;  %531 = vmatprep.mubr.f32.mxu1 %v1161_v0 }
  0x2f   : > { %983 = vmatmul.mubr.msk.f32.gmra.mrb[8].mxu0 %vm365_vm1, %v270_v34  ;;  %989 = vmatmul.mubr.msk.f32.gmra.mrb[8].mxu1 %vm365_vm1, %v276_v35 }
  0x30   : > { %501 = vmatprep.mubr.f32.mxu0 %v1161_v0  ;;  %537 = vmatprep.mubr.f32.mxu1 %v1161_v0 }
  0x33   : > { %984 = vmatmul.mubr.msk.f32.gmra.mrb[10].mxu0 %vm365_vm1, %v271_v38  ;;  %990 = vmatmul.mubr.msk.f32.gmra.mrb[10].mxu1 %vm365_vm1, %v277_v39 }
  0x90   : > { %v1388_v40 = vpop.permute.xlu1 %324 }
  0x91   : > { %v305_v41 = vpop.permute.xlu0 %304 }
  0x94   : > { %v1390_v42 = vpop.permute.xlu1 %329 }
  0x95   : > { %v310_v43 = vpop.permute.xlu0 %309 }
  0x98   : > { %v335_v44 = vpop.permute.xlu1 %334 }
  0x99   : > { %v315_v45 = vpop.permute.xlu0 %314 }
  0xa0   : > { %v350_v46 = vpop.permute.xlu1 %349  ;;  %v345_v47 = vpop.permute.xlu0 %344 }
  0xa4   : > { %v340_v56 = vpop.permute.xlu1 %339  ;;  %v320_v5 = vpop.permute.xlu0 %319 }
  0xa8   : > { %v355_v36 = vpop.permute.xlu0 %354 }
  0xf2   : > { %v473_v48 = vpop.f32.mrb[0].mxu0  ;;  %v509_v49 = vpop.f32.mrb[0].mxu1 }
  0xf3   : > { %v544_v50 = vmax.f32 %v473_v48, %v305_v41  ;;  %v550_v51 = vmax.f32 %v509_v49, %v335_v44  ;;  %v475_v52 = vpop.f32.mrb[1].mxu0  ;;  %v511_v53 = vpop.f32.mrb[1].mxu1 }
  0xf4   : > { %v568_v54 = vmax.f32 %v475_v52, %v305_v41  ;;  %v574_v55 = vmax.f32 %v511_v53, %v335_v44 }
  0xf6   : > { %v479_v57 = vpop.f32.mrb[2].mxu0  ;;  %v515_v58 = vpop.f32.mrb[2].mxu1  ;;  %v580_v59 = vadd.f32 %v568_v54, %v544_v50  ;;  %v586_v60 = vadd.f32 %v574_v55, %v550_v51 }
  0xf7   : > { %v545_v61 = vmax.f32 %v479_v57, %v310_v43  ;;  %v551_v62 = vmax.f32 %v515_v58, %v340_v56  ;;  %v481_v63 = vpop.f32.mrb[3].mxu0  ;;  %v517_v0 = vpop.f32.mrb[3].mxu1 }
  0xf8   : > { %v569_v1 = vmax.f32 %v481_v63, %v310_v43  ;;  %v575_v3 = vmax.f32 %v517_v0, %v340_v56  ;;  %655 = vadd.xlane.f32.xlu0 %v580_v59  ;;  %v360_v50 = vpop.permute.xlu1 %359 }
  0xfa   : > { %v485_v7 = vpop.f32.mrb[4].mxu0  ;;  %v521_v9 = vpop.f32.mrb[4].mxu1  ;;  %v581_v10 = vadd.f32 %v569_v1, %v545_v61  ;;  %v587_v11 = vadd.f32 %v575_v3, %v551_v62 }
  0xfb   : > { %v546_v12 = vmax.f32 %v485_v7, %v315_v45  ;;  %v552_v13 = vmax.f32 %v521_v9, %v345_v47  ;;  %v487_v16 = vpop.f32.mrb[5].mxu0  ;;  %v523_v17 = vpop.f32.mrb[5].mxu1 }
  0xfc   : > { %v570_v18 = vmax.f32 %v487_v16, %v315_v45  ;;  %v576_v19 = vmax.f32 %v523_v17, %v345_v47  ;;  %667 = vadd.xlane.f32.xlu0 %v586_v60  ;;  %657 = vadd.xlane.f32.xlu1 %v581_v10 }
  0xfe   : > { %v491_v22 = vpop.f32.mrb[6].mxu0  ;;  %v527_v23 = vpop.f32.mrb[6].mxu1  ;;  %v582_v24 = vadd.f32 %v570_v18, %v546_v12  ;;  %v588_v25 = vadd.f32 %v576_v19, %v552_v13 }
  0xff   : > { %v547_v28 = vmax.f32 %v491_v22, %v320_v5  ;;  %v553_v29 = vmax.f32 %v527_v23, %v350_v46  ;;  %v493_v30 = vpop.f32.mrb[7].mxu0  ;;  %v529_v31 = vpop.f32.mrb[7].mxu1 }
 0x100   : > { %v571_v34 = vmax.f32 %v493_v30, %v320_v5  ;;  %v577_v35 = vmax.f32 %v529_v31, %v350_v46  ;;  %659 = vadd.xlane.f32.xlu1 %v582_v24 }
 0x102   : > { %v497_v37 = vpop.f32.mrb[8].mxu0  ;;  %v533_v38 = vpop.f32.mrb[8].mxu1  ;;  %v589_v39 = vadd.f32 %v577_v35, %v553_v29  ;;  %v583_v41 = vadd.f32 %v571_v34, %v547_v28 }
 0x103   : > { %v548_v43 = vmax.f32 %v497_v37, %v1388_v40  ;;  %v554_v44 = vmax.f32 %v533_v38, %v355_v36  ;;  %v499_v45 = vpop.f32.mrb[9].mxu0  ;;  %v535_v47 = vpop.f32.mrb[9].mxu1 }
 0x104   : > { %v572_v48 = vmax.f32 %v499_v45, %v1388_v40  ;;  %v578_v49 = vmax.f32 %v535_v47, %v355_v36  ;;  %673 = vadd.xlane.f32.xlu0 %v589_v39  ;;  %671 = vadd.xlane.f32.xlu1 %v588_v25 }
 0x106   : > { %v503_v51 = vpop.f32.mrb[10].mxu0  ;;  %v539_v52 = vpop.f32.mrb[10].mxu1  ;;  %v584_v46 = vadd.f32 %v572_v48, %v548_v43  ;;  %v590_v53 = vadd.f32 %v578_v49, %v554_v44  ;;  %v706_v48 = vld [vmem:[%s1526_s3 + $0x18] sm:$0xff] }
 0x107   : > { %v549_v54 = vmax.f32 %v503_v51, %v1390_v42  ;;  %v555_v55 = vmax.f32 %v539_v52, %v360_v50  ;;  %v505_v56 = vpop.f32.mrb[11].mxu0  ;;  %v541_v57 = vpop.f32.mrb[11].mxu1  ;;  %v991_v52 = vld [vmem:[%s1526_s3 + $0x20] sm:$0xff] }
 0x108   : > { %v573_v58 = vmax.f32 %v505_v56, %v1390_v42  ;;  %v579_v59 = vmax.f32 %v541_v57, %v360_v50  ;;  %661 = vadd.xlane.f32.xlu1 %v583_v41  ;;  %663 = vadd.xlane.f32.xlu0 %v584_v46  ;;  %v997_v57 = vld [vmem:[%s1526_s3 + $0x48] sm:$0xff] }
 0x10a   : > { %v585_v60 = vadd.f32 %v573_v58, %v549_v54  ;;  %v591_v40 = vadd.f32 %v579_v59, %v555_v55  ;;  %v993_v54 = vld [vmem:[%s1526_s3 + $0x30] sm:$0xff]  ;;  %v996_v58 = vld [vmem:[%s1526_s3 + $0x40] sm:$0xff]  ;;  %v992_v59 = vld [vmem:[%s1526_s3 + $0x28] sm:$0xff] }
 0x10c   : > { %675 = vadd.xlane.f32.xlu1 %v590_v53  ;;  %665 = vadd.xlane.f32.xlu0 %v585_v60 }
 0x110   : > { %669 = vadd.xlane.f32.xlu0 %v587_v11 }
 0x114   : > { %677 = vadd.xlane.f32.xlu0 %v591_v40 }
 0x185   : > { %v656_v61 = vpop.xlane.xlu0 %655 }
 0x186   : > { %v679_v62 = vmul.f32 0.00390625, %v656_v61 }
 0x188   : > { %v691_v63 = vadd.f32 %v679_v62, %v1267_v4 }
 0x189   : > { %v668_v0 = vpop.xlane.xlu0 %667  ;;  %v658_v1 = vpop.xlane.xlu1 %657 }
 0x18a   : > { %v685_v3 = vmul.f32 0.00390625, %v668_v0  ;;  %v680_v5 = vmul.f32 0.00390625, %v658_v1  ;;  %709 = vperm.xlu1 %1067, %v691_v63   ;;  %v998_v63 = vld [vmem:[%s1526_s3 + $0x50] sm:$0xff] }
 0x18c   : > { %v697_v42 = vadd.f32 %v685_v3, %v1291_v14  ;;  %v692_v7 = vadd.f32 %v680_v5, %v1278_v8 }
 0x18d   : > { %v660_v9 = vpop.xlane.xlu1 %659 }
 0x18e   : > { %v681_v10 = vmul.f32 0.00390625, %v660_v9  ;;  %777 = vperm.xlu1 %1067, %v697_v42   ;;  %714 = vperm.xlu0 %1066, %v692_v7   ;;  %v994_v9 = vld [vmem:[%s1526_s3 + $0x38] sm:$0xff] }
 0x190   : > { %v693_v11 = vadd.f32 %v681_v10, %v1296_v15 }
 0x191   : > { %v674_v12 = vpop.xlane.xlu0 %673  ;;  %v672_v13 = vpop.xlane.xlu1 %671 }
 0x192   : > { %v688_v16 = vmul.f32 0.00390625, %v674_v12  ;;  %v687_v17 = vmul.f32 0.00390625, %v672_v13  ;;  %719 = vperm.xlu0 %1066, %v693_v11  }
 0x194   : > { %v700_v4 = vadd.f32 %v688_v16, %v1313_v20  ;;  %v699_v18 = vadd.f32 %v687_v17, %v1318_v21 }
 0x195   : > { %v662_v19 = vpop.xlane.xlu1 %661  ;;  %v664_v22 = vpop.xlane.xlu0 %663 }
 0x196   : > { %v682_v14 = vmul.f32 0.00390625, %v662_v19  ;;  %v683_v23 = vmul.f32 0.00390625, %v664_v22  ;;  %829 = vperm.xlu1 %1067, %v700_v4   ;;  %824 = vperm.xlu0 %1066, %v699_v18  }
 0x198   : > { %v694_v8 = vadd.f32 %v682_v14, %v1340_v27  ;;  %v695_v24 = vadd.f32 %v683_v23, %v1258_v2 }
 0x199   : > { %v676_v15 = vpop.xlane.xlu1 %675  ;;  %v666_v25 = vpop.xlane.xlu0 %665 }
 0x19a   : > { %v689_v28 = vmul.f32 0.00390625, %v676_v15  ;;  %v684_v29 = vmul.f32 0.00390625, %v666_v25  ;;  %767 = vperm.xlu1 %1067, %v695_v24   ;;  %724 = vperm.xlu0 %1066, %v694_v8   ;;  %v999_v8 = vld [vmem:[%s1526_s3 + $0x58] sm:$0xff] }
 0x19c   : > { %v701_v20 = vadd.f32 %v689_v28, %v1362_v33  ;;  %v696_v21 = vadd.f32 %v684_v29, %v1272_v6  ;;  %v704_v33 = vld [vmem:[%s1526_s3 + $0x8] sm:$0xff]  ;;  %v703_v6 = vld [vmem:[%s1526_s3] sm:$0xff] }
 0x19d   : > { %v670_v30 = vpop.xlane.xlu0 %669 }
 0x19e   : > { %v686_v31 = vmul.f32 0.00390625, %v670_v30  ;;  %834 = vperm.xlu0 %1066, %v701_v20   ;;  %772 = vperm.xlu1 %1067, %v696_v21  }
 0x1a0   : > { %v698_v34 = vadd.f32 %v686_v31, %v1335_v26  ;;  %v705_v26 = vld [vmem:[%s1526_s3 + $0x10] sm:$0xff] }
 0x1a1   : > { %v678_v35 = vpop.xlane.xlu0 %677 }
 0x1a2   : > { %v690_v27 = vmul.f32 0.00390625, %v678_v35  ;;  %782 = vperm.xlu1 %1067, %v698_v34  }
 0x1a4   : > { %v702_v2 = vadd.f32 %v690_v27, %v1357_v32  ;;  %v745_v27 = vld [vmem:[%s1527_s4] sm:$0x1] }
 0x1a6   : > { %839 = vperm.xlu1 %1067, %v702_v2  }
 0x209   : > { %v710_v36 = vpop.permute.xlu1 %709 }
 0x20a   : > { %v727_v43 = vmul.f32 %v710_v36, %v703_v6 }
 0x20c   : > { %v732_v49 = vsel %vm731_vm2, %v727_v43, 0.0 }
 0x20d   : > { %v715_v37 = vpop.permute.xlu0 %714  ;;  %v778_v38 = vpop.permute.xlu1 %777 }
 0x20e   : > { %v728_v41 = vmul.f32 %v715_v37, %v704_v33  ;;  %v787_v1 = vmul.f32 %v993_v54, %v778_v38 }
 0x210   : > { %v733_v47 = vsel %vm731_vm2, %v728_v41, 0.0  ;;  %v792_v4 = vsel %vm731_vm2, %v787_v1, 0.0 }
 0x211   : > { %v720_v39 = vpop.permute.xlu0 %719  ;;  %v734_v51 = vadd.f32 %v733_v47, %v732_v49 }
 0x212   : > { %v729_v32 = vmul.f32 %v720_v39, %v705_v26 }
 0x214   : > { %v735_v50 = vsel %vm731_vm2, %v729_v32, 0.0 }
 0x215   : > { %v830_v44 = vpop.permute.xlu1 %829  ;;  %v825_v45 = vpop.permute.xlu0 %824  ;;  %v736_v56 = vadd.f32 %v735_v50, %v734_v51  ;;  %v1000_v50 = vld [vmem:[%s1527_s4 + $0x2] sm:$0x1] }
 0x216   : > { %v843_v3 = vmul.f32 %v997_v57, %v830_v44  ;;  %v842_v5 = vmul.f32 %v996_v58, %v825_v45  ;;  %v995_v44 = vld [vmem:[%s1527_s4 + $0x1] sm:$0x1] }
 0x218   : > { %v847_v18 = vsel %vm731_vm2, %v843_v3, 0.0  ;;  %v846_v19 = vsel %vm731_vm2, %v842_v5, 0.0 }
 0x219   : > { %v768_v46 = vpop.permute.xlu1 %767  ;;  %v725_v53 = vpop.permute.xlu0 %724  ;;  %v848_v25 = vadd.f32 %v847_v18, %v846_v19 }
 0x21a   : > { %v730_v55 = vmul.f32 %v725_v53, %v706_v48  ;;  %v785_v60 = vmul.f32 %v991_v52, %v768_v46 }
 0x21c   : > { %v737_v40 = vsel %vm731_vm2, %v730_v55, 0.0  ;;  %v789_v10 = vsel %vm731_vm2, %v785_v60, 0.0 }
 0x21d   : > { %v738_v61 = vadd.f32 %v737_v40, %v736_v56  ;;  %v773_v62 = vpop.permute.xlu1 %772  ;;  %v835_v0 = vpop.permute.xlu0 %834 }
 0x21e   : > { %v786_v42 = vmul.f32 %v992_v59, %v773_v62  ;;  %v844_v12 = vmul.f32 %v998_v63, %v835_v0 }
 0x21f   : > { %v739_v7 = vrot.slane %v738_v61, 4 }
 0x220   : > { %v790_v11 = vsel %vm731_vm2, %v786_v42, 0.0  ;;  %v849_v24 = vsel %vm731_vm2, %v844_v12, 0.0 }
 0x221   : > { %v740_v13 = vadd.f32 %v739_v7, %v738_v61  ;;  %v791_v16 = vadd.f32 %v790_v11, %v789_v10  ;;  %v783_v17 = vpop.permute.xlu1 %782  ;;  %v850_v30 = vadd.f32 %v849_v24, %v848_v25 }
 0x222   : > { %v788_v22 = vmul.f32 %v994_v9, %v783_v17 }
 0x223   : > { %v741_v14 = vrot.slane %v740_v13, 2  ;;  %v793_v23 = vadd.f32 %v792_v4, %v791_v16 }
 0x224   : > { %v794_v15 = vsel %vm731_vm2, %v788_v22, 0.0 }
 0x225   : > { %v795_v28 = vadd.f32 %v794_v15, %v793_v23  ;;  %v840_v29 = vpop.permute.xlu1 %839  ;;  %v742_v20 = vadd.f32 %v741_v14, %v740_v13 }
 0x226   : > { %v845_v21 = vmul.f32 %v999_v8, %v840_v29 }
 0x227   : > { %v796_v31 = vrot.slane %v795_v28, 4  ;;  %v743_v34 = vrot.slane %v742_v20, 1 }
 0x228   : > { %v851_v35 = vsel %vm731_vm2, %v845_v21, 0.0 }
 0x229   : > { %v797_v2 = vadd.f32 %v796_v31, %v795_v28  ;;  %v852_v36 = vadd.f32 %v851_v35, %v850_v30  ;;  %v744_v37 = vadd.f32 %v743_v34, %v742_v20 }
 0x22b   : > { %v798_v33 = vrot.slane %v797_v2, 2  ;;  %v853_v6 = vrot.slane %v852_v36, 4  ;;  %v746_v38 = vadd.f32 %v745_v27, %v744_v37 }
 0x22d   : > { %v854_v26 = vadd.f32 %v853_v6, %v852_v36  ;;  %v748_v39 = vsel %vm747_vm3, %v746_v38, -inf  ;;  %v799_v41 = vadd.f32 %v798_v33, %v797_v2 }
 0x22e   : > { %749 = vmax.xlane.f32.xlu0 %v748_v39 }
 0x22f   : > { %v855_v43 = vrot.slane %v854_v26, 2  ;;  %v800_v32 = vrot.slane %v799_v41, 1 }
 0x231   : > { %v801_v45 = vadd.f32 %v800_v32, %v799_v41  ;;  %v856_v47 = vadd.f32 %v855_v43, %v854_v26 }
 0x233   : > { %v804_v48 = vadd.f32 %v995_v44, %v801_v45  ;;  %v857_v49 = vrot.slane %v856_v47, 1 }
 0x235   : > { %v805_v51 = vsel %vm747_vm3, %v804_v48, -inf  ;;  %v858_v52 = vadd.f32 %v857_v49, %v856_v47 }
 0x236   : > { %806 = vmax.xlane.f32.xlu1 %v805_v51 }
 0x237   : > { %v861_v46 = vadd.f32 %v1000_v50, %v858_v52 }
 0x239   : > { %v862_v53 = vsel %vm747_vm3, %v861_v46, -inf }
 0x23a   : > { %863 = vmax.xlane.f32.xlu0 %v862_v53 }
 0x2bb   : > { %v750_v54 = vpop.xlane.xlu0 %749 }
 0x2bc   : > { %v751_v55 = vsub.f32 %v746_v38, %v750_v54 }
 0x2be   : > { %v752_v56 = vmul.f32 1.442695, %v751_v55 }
 0x2c0   : > { %1069 = vpow2.f32 %v752_v56 }
 0x2c3   : > { %v807_v57 = vpop.xlane.xlu1 %806 }
 0x2c4   : > { %v808_v58 = vsub.f32 %v804_v48, %v807_v57 }
 0x2c6   : > { %v809_v59 = vmul.f32 1.442695, %v808_v58 }
 0x2c7   : > { %v864_v60 = vpop.xlane.xlu0 %863 }
 0x2c8   : > { %1071 = vpow2.f32 %v809_v59  ;;  %v865_v40 = vsub.f32 %v861_v46, %v864_v60 }
 0x2ca   : > { %v1070_v61 = vpop.eup %1069  ;;  %v866_v62 = vmul.f32 1.442695, %v865_v40 }
 0x2cb   : > { %v754_v63 = vsel %vm747_vm3, %v1070_v61, 0.0 }
 0x2cc   : > { %1073 = vpow2.f32 %v866_v62  ;;  %755 = vadd.xlane.f32.xlu0 %v754_v63 }
 0x2d2   : > { %v1072_v0 = vpop.eup %1071 }
 0x2d3   : > { %v811_v1 = vsel %vm747_vm3, %v1072_v0, 0.0 }
 0x2d4   : > { %812 = vadd.xlane.f32.xlu1 %v811_v1 }
 0x2d6   : > { %v1074_v3 = vpop.eup %1073 }
 0x2d7   : > { %v868_v5 = vsel %vm747_vm3, %v1074_v3, 0.0 }
 0x2d8   : > { %869 = vadd.xlane.f32.xlu0 %v868_v5 }
 0x359   : > { %v756_v42 = vpop.xlane.xlu0 %755 }
 0x35a   : > { %1075 = vrcp.f32 %v756_v42 }
 0x361   : > { %v813_v7 = vpop.xlane.xlu1 %812 }
 0x362   : > { %1077 = vrcp.f32 %v813_v7 }
 0x364   : > { %v1076_v10 = vpop.eup %1075 }
 0x365   : > { %v870_v9 = vpop.xlane.xlu0 %869  ;;  %v758_v13 = vmul.f32 %v1076_v10, %v1070_v61 }
 0x366   : > { %1079 = vrcp.f32 %v870_v9 }
 0x36c   : > { %v1078_v11 = vpop.eup %1077 }
 0x36d   : > { %v815_v12 = vmul.f32 %v1078_v11, %v1072_v0 }
 0x36f   : > { %v816_v17 = vadd.f32 %v815_v12, %v758_v13 }
 0x370   : > { %v1080_v16 = vpop.eup %1079 }
 0x371   : > { %v872_v4 = vmul.f32 %v1080_v16, %v1074_v3 }
 0x373   : > { %v873_v18 = vadd.f32 %v872_v4, %v816_v17 }
 0x375   : > { %v874_v19 = vmul.f32 0.33333334, %v873_v18 }
 0x377   : > { %883 = vrot.lane.b32.xlu0 %v874_v19, %s1163_s15  ;;  %v875_v22 = vsub.f32 1.0, %v874_v19 }
 0x379   : > { %877 = vrot.lane.b32.xlu1 %v875_v22, %s1164_s16 }
 0x3e9   : > { %v884_v23 = vpop.permute.xlu0 %883 }
 0x3eb   : > { %v878_v14 = vpop.permute.xlu1 %877 }
 0x3ec   : > { %881 = vst.msk [vmem:[%s239_s25] sm:$0x1] %vm880_vm4, %v878_v14 }
 0x3ed   : > { %887 = vst.msk [vmem:[%s239_s25] sm:$0x1] %vm886_vm5, %v884_v23 }
 0x3ee   : > { %1094 = shalt.err (!%p1091_p5)
}
 0x3ef   : > { %s1095_s13 = scalar_lea.hbm %s1476_s8, 16  ;;  %s1099_s16 = scalar_lea.hbm %s1528_s5, 32 }
 0x3f0   : > { %p1096_p6 = scmp.ne.s32.totalorder %s1476_s8, %s1095_s13  ;;  %p1100_p10 = scmp.lt.u32.totalorder %s1476_s8, %s1528_s5 }
 0x3f1   : > { %p1101_p11 = scmp.lt.u32.totalorder %s1099_s16, %s1095_s13  ;;  %p1103_p13 = scmp.lt.u32.totalorder %s1095_s13, %s1476_s8 }
 0x3f2   : > { %p1097_p7 = pnand %p1096_p6, %p1236_p4 }
 0x3f3   : > { %p1102_p12 = por %p1101_p11, %p1100_p10 }
 0x3f4   : > { %p1098_p9 = pneg %p1097_p7 }
 0x3f5   : > { %p1104_p0 = por %p1103_p13, %p1102_p12 }
 0x3f7   : > { %p1105_p1 = pnand %p1104_p0, %p1098_p9 }
 0x3f9   : > { %1108 = shalt.err (!%p1105_p1)
}
 0x3fa   : > { %1007 = dma.vmem_to_hbm [thread:$0]  (%p1236_p4), %s1478_s27, 16, %s1476_s8, %s889_s9  }
 0x3fb PF: > { %p1013_p2 = scmp.ge.s32.totalorder %s1159_s23, 2  ;;  %s913_s25 = sand.u32 1, %s1139_s18  }
 0x3fc   : > { %s914_s29 = scalar_lea.sflag [#allocation4], %s913_s25 }
 0x3fd   : > { %p1010_p3 = pnand %p1013_p2, %p1243_p8 }
 0x3ff   : > { %1134 = dma.done.wait (!%p1010_p3), %s914_s29, 16  }
 0x400   : > { %1136 = vsyncadd (!%p1010_p3), %s914_s29, 4294967280  ;;  %s18_s23 = sadd.s32 1, %s1159_s23   ;;  %s1531_s18 = smov %s1143_s19 }
 0x401   : > { %p15_p5 = scmp.ge.s32.totalorder %s18_s23, 4   ;;  %s1532_s19 = smov %s1147_s20 }
 0x402   : > { %s1533_s20 = smov %s1249_s6  ;;  %s1534_s21 = smov %s1155_s22 }
 0x403   : > { %s1535_s22 = smov %s1537_s26  ;;  %17 = sbr.rel (!%p15_p5) target bundleno = 4 (0x4), region = 87 }
 0x40a   :  { %918 = vsyncpa [#allocation4], 1 }
 0x40b   :  { %920 = vsyncpa [#allocation4 + $0x1], 1 }

</bundles_post_ra>
